<compile_context>
chip_gen: v6e
topology: v6e:2x2x1
jax: 0.10.0
libtpu: 0.0.40
codegen_flags: <defaults>
</compile_context>

<pallas_src>
import math
import functools

import jax
import jax.numpy as jnp
from jax.experimental import pallas as pl
from jax.experimental.pallas import tpu as pltpu


_V_CHUNK = 128                    # vocab lanes per fused in-vreg chunk
_ROW_TILE_MAX = 128               # rows per fused vocab sweep (vreg-pressure bound)
_BLOCK_ROWS_MAX = 512             # rows per DMA block (per-step-overhead amortization)
_TRG_RESIDENT_BYTES = 12 << 20    # VMEM cap for keeping padded targets resident

_VMEM_CAP_CACHE = None


def _vmem_capacity_bytes():
    """Physical per-TensorCore VMEM (generation aware); cached at first use."""
    global _VMEM_CAP_CACHE
    if _VMEM_CAP_CACHE is None:
        cap = None
        try:
            cap = getattr(pltpu.get_tpu_info(), "vmem_capacity_bytes", None)
        except Exception:
            cap = None
        _VMEM_CAP_CACHE = int(cap) if cap else (128 << 20)
    return _VMEM_CAP_CACHE


# ----------------------------------------------------------------------------
# Kernel: cross entropy with ignore_index (sum + valid-token count per split)
# ----------------------------------------------------------------------------
def _ce_kernel(trg_ref, logits_ref, sum_ref, cnt_ref, sum_part, cnt_part, *,
               pad_index, row_tile, groups, n_full, v_rem, tps, block_rows,
               trg_resident, unroll):
    split = pl.program_id(0)
    j = pl.program_id(1)

    # zero the per-split partial accumulators at the start of each split
    @pl.when(j == 0)
    def _():
        sum_part[...] = jnp.zeros_like(sum_part)
        cnt_part[...] = jnp.zeros_like(cnt_part)

    for g in range(groups):                    # static row-groups inside the block
        r0 = g * row_tile

        def rows(v_off, width, _r0=r0):
            # (row_tile, width) slab of this row-group, upcast to f32 in vregs
            return logits_ref[pl.ds(_r0, row_tile),
                              pl.ds(v_off, width)].astype(jnp.float32)

        if trg_resident:
            # targets stay resident in VMEM across the whole grid; slice in-kernel
            step = split * tps + j
            t0 = pl.multiple_of(step * block_rows + r0, 8)
            trg = trg_ref[pl.ds(t0, row_tile), :]              # (row_tile, 1) int32
        else:
            trg = trg_ref[pl.ds(r0, row_tile), :]

        # ---- pass 1: row max (wide accumulate; one lane-reduce at the end) --
        if n_full > 0:
            def p1(c, acc):
                off = pl.multiple_of(c * _V_CHUNK, _V_CHUNK)
                return jnp.maximum(acc, rows(off, _V_CHUNK))
            mwide = jax.lax.fori_loop(
                0, n_full, p1,
                jnp.full((row_tile, _V_CHUNK), -jnp.inf, jnp.float32),
                unroll=unroll)
            m = jnp.max(mwide, axis=-1, keepdims=True)
        else:
            m = jnp.full((row_tile, 1), -jnp.inf, jnp.float32)
        if v_rem > 0:
            m = jnp.maximum(m, jnp.max(rows(n_full * _V_CHUNK, v_rem),
                                       axis=-1, keepdims=True))

        # ---- pass 2: sum of exp(logit - m) ----------------------------------
        expsum = jnp.zeros((row_tile, 1), jnp.float32)
        if n_full > 0:
            def p2(c, acc):
                off = pl.multiple_of(c * _V_CHUNK, _V_CHUNK)
                return acc + jnp.exp(rows(off, _V_CHUNK) - m)
            swide = jax.lax.fori_loop(
                0, n_full, p2,
                jnp.zeros((row_tile, _V_CHUNK), jnp.float32), unroll=unroll)
            expsum = expsum + jnp.sum(swide, axis=-1, keepdims=True)
        if v_rem > 0:
            expsum = expsum + jnp.sum(jnp.exp(rows(n_full * _V_CHUNK, v_rem) - m),
                                      axis=-1, keepdims=True)

        # ---- pass 3: pick logit[target] via masked accumulate ---------------
        tgt = jnp.zeros((row_tile, 1), jnp.float32)
        if n_full > 0:
            def p3(c, acc):
                off = pl.multiple_of(c * _V_CHUNK, _V_CHUNK)
                col = off + jax.lax.broadcasted_iota(
                    jnp.int32, (row_tile, _V_CHUNK), 1)
                return acc + jnp.where(col == trg, rows(off, _V_CHUNK), 0.0)
            twide = jax.lax.fori_loop(
                0, n_full, p3,
                jnp.zeros((row_tile, _V_CHUNK), jnp.float32), unroll=unroll)
            tgt = tgt + jnp.sum(twide, axis=-1, keepdims=True)
        if v_rem > 0:
            off = n_full * _V_CHUNK
            col = off + jax.lax.broadcasted_iota(jnp.int32, (row_tile, v_rem), 1)
            tgt = tgt + jnp.sum(jnp.where(col == trg, rows(off, v_rem), 0.0),
                                axis=-1, keepdims=True)

        # per-token nll = logsumexp(logits) - logit[target]
        nll = m + jnp.log(expsum) - tgt
        valid = trg != pad_index
        # use where (not *): garbage rows of partial/overhang blocks may be NaN
        sum_part[...] = sum_part[...] + jnp.where(valid, nll, 0.0)
        cnt_part[...] = cnt_part[...] + valid.astype(jnp.float32)

    # finalize this split: reduce the column partials once, write output block
    @pl.when(j == tps - 1)
    def _():
        sum_ref[...] = jnp.zeros_like(sum_ref) + jnp.sum(sum_part[...])
        cnt_ref[...] = jnp.zeros_like(cnt_ref) + jnp.sum(cnt_part[...])


def cross_entropy(logits, targets, *, pad_index):
    """Mean cross entropy over tokens whose target != pad_index.

    logits: (T, V) float32 or bfloat16 (bf16 halves HBM traffic; the kernel
    upcasts to f32 in-vreg); targets: (T,) integer class ids.
    NOTE: if every target equals pad_index the result is NaN, exactly like
    torch.nn.CrossEntropyLoss(ignore_index=pad).
    """
    T, V = logits.shape
    itemsize = jnp.dtype(logits.dtype).itemsize
    sub = 16 if itemsize < 4 else 8            # sublane packing granularity

    # ---- generation-aware VMEM sizing ---------------------------------------
    phys = _vmem_capacity_bytes()
    if phys <= (64 << 20):                     # v7x: 64 MiB VMEM per TensorCore
        work_budget, vmem_cap = 20 << 20, 48 << 20
    else:                                      # v5e / v6e: 128 MiB
        work_budget, vmem_cap = 64 << 20, 100 << 20

    # ---- tiling --------------------------------------------------------------
    rows_needed = -(-T // sub) * sub
    per_row = 2 * V * itemsize + 2048          # dbl-buffered logits row + column slack
    rows_fit = max(sub, min(_ROW_TILE_MAX, (work_budget // per_row) // sub * sub))
    row_tile = min(_ROW_TILE_MAX, rows_needed, rows_fit)

    needed_groups = -(-rows_needed // row_tile)
    budget_groups = max(1, (work_budget // per_row) // row_tile)
    cap_groups = max(1, _BLOCK_ROWS_MAX // row_tile)
    groups = max(1, min(needed_groups, budget_groups, cap_groups))
    block_rows = groups * row_tile             # rows per DMA block

    n_blocks = -(-T // block_rows)             # data blocks (last may be partial)
    num_splits = 2 if n_blocks >= 2 else 1     # feeds both TCs on v7x
    tps = -(-n_blocks // num_splits)           # tiles per split (balanced)
    t_grid = num_splits * tps * block_rows     # rows covered by the grid (>= T)

    n_full, v_rem = divmod(V, _V_CHUNK)
    unroll = True if n_full <= 8 else 8

    # targets padded with pad_index so partial / overhang rows mask to zero
    trg2 = jnp.pad(targets.reshape(T, 1).astype(jnp.int32),
                   ((0, t_grid - T), (0, 0)), constant_values=int(pad_index))

    # a (rows, 1) int32 column lane-pads 128x in VMEM: keep the whole padded
    # target column resident when small (one HBM read for the grid), else one
    # small per-block DMA
    trg_resident = 2 * t_grid * 512 <= _TRG_RESIDENT_BYTES
    if trg_resident:
        trg_spec = pl.BlockSpec((t_grid, 1), lambda c, j: (0, 0))
    else:
        trg_spec = pl.BlockSpec((block_rows, 1), lambda c, j: (c * tps + j, 0))

    if num_splits * tps == n_blocks:
        logits_map = lambda c, j: (c * tps + j, 0)
    else:
        # overhang steps (split balancing) re-read the last block; rows masked
        logits_map = lambda c, j: (jnp.minimum(c * tps + j, n_blocks - 1), 0)

    vmem_need = (2 * block_rows * V * itemsize                  # dbl-buffered logits
                 + 2 * (t_grid if trg_resident else block_rows) * 512
                 + 2 * row_tile * 512                           # scratch columns
                 + (6 << 20))                                   # spill / margin
    # TODO(synk): for vocabularies so large that even an 8-row f32 block exceeds
    # the cap (V >~ 1M f32 on v7x), add a vocab-axis grid split w/ online logsumexp.
    vmem_limit = int(min(max(vmem_need, 32 << 20), vmem_cap))

    kernel = functools.partial(
        _ce_kernel, pad_index=int(pad_index), row_tile=int(row_tile),
        groups=int(groups), n_full=int(n_full), v_rem=int(v_rem), tps=int(tps),
        block_rows=int(block_rows), trg_resident=bool(trg_resident),
        unroll=unroll)

    sums, cnts = pl.pallas_call(
        kernel,
        out_shape=(jax.ShapeDtypeStruct((num_splits, 8, 128), jnp.float32),
                   jax.ShapeDtypeStruct((num_splits, 8, 128), jnp.float32)),
        grid_spec=pltpu.PrefetchScalarGridSpec(
            num_scalar_prefetch=0,
            grid=(num_splits, tps),
            in_specs=[trg_spec,
                      pl.BlockSpec((block_rows, V), logits_map)],
            out_specs=(pl.BlockSpec((1, 8, 128), lambda c, j: (c, 0, 0)),
                       pl.BlockSpec((1, 8, 128), lambda c, j: (c, 0, 0))),
            scratch_shapes=[pltpu.VMEM((row_tile, 1), jnp.float32),
                            pltpu.VMEM((row_tile, 1), jnp.float32)]),
        compiler_params=pltpu.CompilerParams(
            dimension_semantics=("parallel", "arbitrary"),
            vmem_limit_bytes=vmem_limit),
    )(trg2, logits)

    # accumulator value is broadcast across each (8,128) block; read one lane
    return jnp.sum(sums[:, 0, 0]) / jnp.sum(cnts[:, 0, 0])


# ----------------------------------------------------------------------------
# One jitted device step: both losses in a single dispatch (no early host sync)
# ----------------------------------------------------------------------------
@functools.partial(jax.jit, static_argnames=("pad_index",))
def _train_losses(word_outputs, trg, Q_used, Q_target, *, pad_index):
    # bf16 logits halve HBM traffic for the only large operand; the kernel
    # upcasts to f32 in-vreg.  The cast is a no-op for bf16 activations and
    # fuses with the producing op when the criterion runs inside the model jit.
    logits = word_outputs.astype(jnp.bfloat16).reshape(-1, word_outputs.shape[-1])
    mist = cross_entropy(logits, trg.reshape(-1), pad_index=pad_index)
    # Policy loss: MSE(reduction='sum') / count_nonzero.  Q is only a few KiB;
    # a dedicated pallas_call costs more in launch overhead than the math.
    # (All-zero Q_target gives Inf/NaN, same as the PyTorch module.)
    d = (Q_used - Q_target).astype(jnp.float32)
    policy = jnp.sum(d * d) / jnp.count_nonzero(Q_target).astype(jnp.float32)
    return mist, policy


@functools.partial(jax.jit, static_argnames=("pad_index",))
def _eval_loss(word_outputs, trg, *, pad_index):
    logits = word_outputs.astype(jnp.bfloat16).reshape(-1, word_outputs.shape[-1])
    return cross_entropy(logits, trg.reshape(-1), pad_index=pad_index)


# ----------------------------------------------------------------------------
# Criterion (host-side stateful bookkeeping, Pallas kernel for the heavy math)
# ----------------------------------------------------------------------------
class RLSTCriterion:
    def __init__(self, rho, pad_index, N, eta_min, eta_max):
        self.RHO = rho
        self.rho_to_n = 1
        self.n = -1
        self.N = N
        self.eta_min = eta_min
        self.eta_max = eta_max
        self.mistranslation_loss_weight = 0
        self.policy_loss_weight = 0
        self.pad_index = pad_index
        self.eta = 0
        self.training = True

    def train(self):
        self.training = True
        return self

    def eval(self):
        self.training = False
        return self

    def forward(self, word_outputs, trg, Q_used, Q_target):
        if self.training:
            # single jitted dispatch for both losses
            mist, policy = _train_losses(word_outputs, trg, Q_used, Q_target,
                                         pad_index=self.pad_index)
            self.n += 1
            self.eta = self.eta_max - (self.eta_max - self.eta_min) * \
                math.e ** (-3 * self.n / self.N)
            self.rho_to_n *= self.RHO
            w_k = (self.RHO - self.rho_to_n) / (1 - self.rho_to_n)
            # single device->host sync for both scalars (EMA state is host-side,
            # exactly as in the PyTorch module)
            mist_f, policy_f = (float(x) for x in jax.device_get((mist, policy)))
            self.mistranslation_loss_weight = (
                w_k * self.mistranslation_loss_weight + (1 - w_k) * mist_f)
            self.policy_loss_weight = (
                w_k * self.policy_loss_weight + (1 - w_k) * policy_f)
            loss = (policy * (self.eta / self.policy_loss_weight)
                    + mist * (1.0 / self.mistranslation_loss_weight))
            return loss, mist, policy, self.eta
        mist = _eval_loss(word_outputs, trg, pad_index=self.pad_index)
        return None, mist, None, None

    __call__ = forward


if __name__ == "__main__":
    key = jax.random.PRNGKey(0)
    k1, k2, k3, k4, k5 = jax.random.split(key, 5)

    B, S, V = 4, 16, 256        # batch, seq, vocab  ->  T = 64 tokens
    S_RL = 32                   # RL horizon for the Q values
    PAD = 0

    word_outputs = jax.random.normal(k1, (B, S, V), dtype=jnp.float32)
    trg = jax.random.randint(k2, (B, S), 0, V, dtype=jnp.int32)   # some == PAD
    Q_used = jax.random.normal(k3, (B, S_RL), dtype=jnp.float32)
    Q_target = jax.random.normal(k4, (B, S_RL), dtype=jnp.float32)
    Q_target = Q_target * (jax.random.uniform(k5, (B, S_RL)) > 0.2)  # inject zeros

    # --- correctness check of the CE kernel against a pure-JAX reference ---
    logits32 = word_outputs.reshape(-1, V)
    tgt = trg.reshape(-1)

    def ref_ce(lg):
        lp = jax.nn.log_softmax(lg.astype(jnp.float32), axis=-1)
        nll = -jnp.take_along_axis(lp, tgt[:, None], axis=-1)[:, 0]
        valid = tgt != PAD
        return jnp.sum(jnp.where(valid, nll, 0.0)) / jnp.sum(valid)

    got32 = cross_entropy(logits32, tgt, pad_index=PAD)            # f32 path
    ref32 = ref_ce(logits32)
    assert abs(float(got32) - float(ref32)) <= 2e-3 * max(1.0, abs(float(ref32))), \
        (float(got32), float(ref32))

    logits16 = logits32.astype(jnp.bfloat16)                       # bf16 path
    got16 = cross_entropy(logits16, tgt, pad_index=PAD)
    ref16 = ref_ce(logits16)
    assert abs(float(got16) - float(ref16)) <= 2e-3 * max(1.0, abs(float(ref16))), \
        (float(got16), float(ref16))

    crit = RLSTCriterion(rho=0.99, pad_index=PAD, N=1000, eta_min=0.1, eta_max=1.0)

    # two training-mode forwards (exercises the EMA bookkeeping)
    loss, mist, pol, eta = crit.forward(word_outputs, trg, Q_used, Q_target)
    jax.block_until_ready((loss, mist, pol))
    loss, mist, pol, eta = crit.forward(word_outputs, trg, Q_used, Q_target)
    jax.block_until_ready((loss, mist, pol))

    # eval-mode forward
    crit.eval()
    _, mist_eval, _, _ = crit.forward(word_outputs, trg, Q_used, Q_target)
    jax.block_until_ready(mist_eval)

    print("KERNEL_OK")
</pallas_src>

<mosaic_0001>
module attributes {stable_mosaic.version = 11 : i64} {
  func.func @_ce_kernel(%arg0: i32, %arg1: i32, %arg2: memref<64x1xi32, #tpu.memory_space<vmem>>, %arg3: memref<64x256xf32, #tpu.memory_space<vmem>>, %arg4: memref<1x8x128xf32, #tpu.memory_space<vmem>>, %arg5: memref<1x8x128xf32, #tpu.memory_space<vmem>>, %arg6: memref<64x1xf32, #tpu.memory_space<vmem>>, %arg7: memref<64x1xf32, #tpu.memory_space<vmem>>) attributes {dimension_semantics = [#tpu.dimension_semantics<parallel>, #tpu.dimension_semantics<arbitrary>], iteration_bounds = array<i64: 1, 1>, scalar_prefetch = 0 : i64, scratch_operands = 2 : i64, tpu.core_type = #tpu.core_type<tc>, window_params = [{pipeline_mode = #tpu.pipeline_mode<synchronous>, transform_indices = @transform_0, window_bounds = array<i64: 64, 1>}, {transform_indices = @transform_1, window_bounds = array<i64: 64, 256>}, {transform_indices = @transform_2, window_bounds = array<i64: 1, 8, 128>}, {transform_indices = @transform_3, window_bounds = array<i64: 1, 8, 128>}]} {
    %c0_i32 = arith.constant 0 : i32
    %0 = arith.cmpi eq, %arg1, %c0_i32 : i32
    %1 = arith.extui %0 : i1 to i32
    %c0_i32_0 = arith.constant 0 : i32
    %2 = arith.cmpi ne, %1, %c0_i32_0 : i32
    scf.if %2 {
      %cst_42 = arith.constant 0.000000e+00 : f32
      %91 = vector.broadcast %cst_42 : f32 to vector<64x1xf32>
      %c0_43 = arith.constant 0 : index
      %c0_44 = arith.constant 0 : index
      %92 = vector.load %arg6[%c0_43, %c0_44] : memref<64x1xf32, #tpu.memory_space<vmem>>, vector<64x1xf32>
      tpu.vector_store %arg6[%c0_43, %c0_44], %91 {strides = array<i32>} : memref<64x1xf32, #tpu.memory_space<vmem>>, vector<64x1xf32>,
      %cst_45 = arith.constant 0.000000e+00 : f32
      %93 = vector.broadcast %cst_45 : f32 to vector<64x1xf32>
      %c0_46 = arith.constant 0 : index
      %c0_47 = arith.constant 0 : index
      %94 = vector.load %arg7[%c0_46, %c0_47] : memref<64x1xf32, #tpu.memory_space<vmem>>, vector<64x1xf32>
      tpu.vector_store %arg7[%c0_46, %c0_47], %93 {strides = array<i32>} : memref<64x1xf32, #tpu.memory_space<vmem>>, vector<64x1xf32>,
    } else {
    }
    %c1_i32 = arith.constant 1 : i32
    %3 = arith.muli %arg0, %c1_i32 : i32
    %4 = arith.addi %3, %arg1 : i32
    %c64_i32 = arith.constant 64 : i32
    %5 = arith.muli %4, %c64_i32 : i32
    %c0_i32_1 = arith.constant 0 : i32
    %6 = arith.addi %5, %c0_i32_1 : i32
    %7 = tpu.assume_multiple %6, 8 : i32
    %8 = arith.index_cast %7 : i32 to index
    %c0 = arith.constant 0 : index
    %9 = vector.load %arg2[%8, %c0] : memref<64x1xi32, #tpu.memory_space<vmem>>, vector<64x1xi32>
    %cst = arith.constant 0xFF800000 : f32
    %10 = vector.broadcast %cst : f32 to vector<64x128xf32>
    %c0_i32_2 = arith.constant 0 : i32
    %c128_i32 = arith.constant 128 : i32
    %11 = arith.muli %c0_i32_2, %c128_i32 : i32
    %12 = tpu.assume_multiple %11, 128 : i32
    %c0_3 = arith.constant 0 : index
    %13 = arith.index_cast %12 : i32 to index
    %14 = vector.load %arg3[%c0_3, %13] : memref<64x256xf32, #tpu.memory_space<vmem>>, vector<64x128xf32>
    %15 = arith.maximumf %10, %14 : vector<64x128xf32>
    %c1_i32_4 = arith.constant 1 : i32
    %c128_i32_5 = arith.constant 128 : i32
    %16 = arith.muli %c1_i32_4, %c128_i32_5 : i32
    %17 = tpu.assume_multiple %16, 128 : i32
    %c0_6 = arith.constant 0 : index
    %18 = arith.index_cast %17 : i32 to index
    %19 = vector.load %arg3[%c0_6, %18] : memref<64x256xf32, #tpu.memory_space<vmem>>, vector<64x128xf32>
    %20 = arith.maximumf %15, %19 : vector<64x128xf32>
    %c2_i32 = arith.constant 2 : i32
    %cst_7 = arith.constant dense<0xFF800000> : vector<64xf32>
    %21 = vector.multi_reduction <maximumf>, %20, %cst_7 [1] : vector<64x128xf32> to vector<64xf32>
    %22 = vector.shape_cast %21 : vector<64xf32> to vector<64x1xf32>
    %cst_8 = arith.constant 0.000000e+00 : f32
    %23 = vector.broadcast %cst_8 : f32 to vector<64x1xf32>
    %cst_9 = arith.constant 0.000000e+00 : f32
    %24 = vector.broadcast %cst_9 : f32 to vector<64x128xf32>
    %c0_i32_10 = arith.constant 0 : i32
    %c128_i32_11 = arith.constant 128 : i32
    %25 = arith.muli %c0_i32_10, %c128_i32_11 : i32
    %26 = tpu.assume_multiple %25, 128 : i32
    %c0_12 = arith.constant 0 : index
    %27 = arith.index_cast %26 : i32 to index
    %28 = vector.load %arg3[%c0_12, %27] : memref<64x256xf32, #tpu.memory_space<vmem>>, vector<64x128xf32>
    %29 = vector.broadcast %22 : vector<64x1xf32> to vector<64x128xf32>
    %30 = arith.subf %28, %29 : vector<64x128xf32>
    %31 = math.exp %30 : vector<64x128xf32>
    %32 = arith.addf %24, %31 : vector<64x128xf32>
    %c1_i32_13 = arith.constant 1 : i32
    %c128_i32_14 = arith.constant 128 : i32
    %33 = arith.muli %c1_i32_13, %c128_i32_14 : i32
    %34 = tpu.assume_multiple %33, 128 : i32
    %c0_15 = arith.constant 0 : index
    %35 = arith.index_cast %34 : i32 to index
    %36 = vector.load %arg3[%c0_15, %35] : memref<64x256xf32, #tpu.memory_space<vmem>>, vector<64x128xf32>
    %37 = vector.broadcast %22 : vector<64x1xf32> to vector<64x128xf32>
    %38 = arith.subf %36, %37 : vector<64x128xf32>
    %39 = math.exp %38 : vector<64x128xf32>
    %40 = arith.addf %32, %39 : vector<64x128xf32>
    %c2_i32_16 = arith.constant 2 : i32
    %cst_17 = arith.constant dense<0.000000e+00> : vector<64xf32>
    %41 = vector.multi_reduction <add>, %40, %cst_17 [1] : vector<64x128xf32> to vector<64xf32>
    %42 = vector.shape_cast %41 : vector<64xf32> to vector<64x1xf32>
    %43 = arith.addf %23, %42 : vector<64x1xf32>
    %cst_18 = arith.constant 0.000000e+00 : f32
    %44 = vector.broadcast %cst_18 : f32 to vector<64x1xf32>
    %cst_19 = arith.constant 0.000000e+00 : f32
    %45 = vector.broadcast %cst_19 : f32 to vector<64x128xf32>
    %c0_i32_20 = arith.constant 0 : i32
    %c128_i32_21 = arith.constant 128 : i32
    %46 = arith.muli %c0_i32_20, %c128_i32_21 : i32
    %47 = tpu.assume_multiple %46, 128 : i32
    %48 = tpu.iota {dimensions = array<i32: 1>} : vector<64x128xi32>
    %49 = vector.broadcast %47 : i32 to vector<64x128xi32>
    %50 = arith.addi %49, %48 : vector<64x128xi32>
    %51 = vector.broadcast %9 : vector<64x1xi32> to vector<64x128xi32>
    %52 = arith.cmpi eq, %50, %51 : vector<64x128xi32>
    %c0_22 = arith.constant 0 : index
    %53 = arith.index_cast %47 : i32 to index
    %54 = vector.load %arg3[%c0_22, %53] : memref<64x256xf32, #tpu.memory_space<vmem>>, vector<64x128xf32>
    %cst_23 = arith.constant 0.000000e+00 : f32
    %55 = vector.broadcast %cst_23 : f32 to vector<64x128xf32>
    %56 = arith.select %52, %54, %55 : vector<64x128xi1>, vector<64x128xf32>
    %57 = arith.addf %45, %56 : vector<64x128xf32>
    %c1_i32_24 = arith.constant 1 : i32
    %c128_i32_25 = arith.constant 128 : i32
    %58 = arith.muli %c1_i32_24, %c128_i32_25 : i32
    %59 = tpu.assume_multiple %58, 128 : i32
    %60 = tpu.iota {dimensions = array<i32: 1>} : vector<64x128xi32>
    %61 = vector.broadcast %59 : i32 to vector<64x128xi32>
    %62 = arith.addi %61, %60 : vector<64x128xi32>
    %63 = vector.broadcast %9 : vector<64x1xi32> to vector<64x128xi32>
    %64 = arith.cmpi eq, %62, %63 : vector<64x128xi32>
    %c0_26 = arith.constant 0 : index
    %65 = arith.index_cast %59 : i32 to index
    %66 = vector.load %arg3[%c0_26, %65] : memref<64x256xf32, #tpu.memory_space<vmem>>, vector<64x128xf32>
    %cst_27 = arith.constant 0.000000e+00 : f32
    %67 = vector.broadcast %cst_27 : f32 to vector<64x128xf32>
    %68 = arith.select %64, %66, %67 : vector<64x128xi1>, vector<64x128xf32>
    %69 = arith.addf %57, %68 : vector<64x128xf32>
    %c2_i32_28 = arith.constant 2 : i32
    %cst_29 = arith.constant dense<0.000000e+00> : vector<64xf32>
    %70 = vector.multi_reduction <add>, %69, %cst_29 [1] : vector<64x128xf32> to vector<64xf32>
    %71 = vector.shape_cast %70 : vector<64xf32> to vector<64x1xf32>
    %72 = arith.addf %44, %71 : vector<64x1xf32>
    %73 = math.log %43 : vector<64x1xf32>
    %74 = arith.addf %22, %73 : vector<64x1xf32>
    %75 = arith.subf %74, %72 : vector<64x1xf32>
    %c0_i32_30 = arith.constant 0 : i32
    %76 = vector.broadcast %c0_i32_30 : i32 to vector<64x1xi32>
    %77 = arith.cmpi ne, %9, %76 : vector<64x1xi32>
    %c0_31 = arith.constant 0 : index
    %c0_32 = arith.constant 0 : index
    %78 = vector.load %arg6[%c0_31, %c0_32] : memref<64x1xf32, #tpu.memory_space<vmem>>, vector<64x1xf32>
    %cst_33 = arith.constant 0.000000e+00 : f32
    %79 = vector.broadcast %cst_33 : f32 to vector<64x1xf32>
    %80 = arith.select %77, %75, %79 : vector<64x1xi1>, vector<64x1xf32>
    %81 = arith.addf %78, %80 : vector<64x1xf32>
    %c0_34 = arith.constant 0 : index
    %c0_35 = arith.constant 0 : index
    %82 = vector.load %arg6[%c0_34, %c0_35] : memref<64x1xf32, #tpu.memory_space<vmem>>, vector<64x1xf32>
    tpu.vector_store %arg6[%c0_34, %c0_35], %81 {strides = array<i32>} : memref<64x1xf32, #tpu.memory_space<vmem>>, vector<64x1xf32>,
    %c0_36 = arith.constant 0 : index
    %c0_37 = arith.constant 0 : index
    %83 = vector.load %arg7[%c0_36, %c0_37] : memref<64x1xf32, #tpu.memory_space<vmem>>, vector<64x1xf32>
    %84 = arith.extui %77 : vector<64x1xi1> to vector<64x1xi32>
    %85 = arith.sitofp %84 : vector<64x1xi32> to vector<64x1xf32>
    %86 = arith.addf %83, %85 : vector<64x1xf32>
    %c0_38 = arith.constant 0 : index
    %c0_39 = arith.constant 0 : index
    %87 = vector.load %arg7[%c0_38, %c0_39] : memref<64x1xf32, #tpu.memory_space<vmem>>, vector<64x1xf32>
    tpu.vector_store %arg7[%c0_38, %c0_39], %86 {strides = array<i32>} : memref<64x1xf32, #tpu.memory_space<vmem>>, vector<64x1xf32>,
    %c0_i32_40 = arith.constant 0 : i32
    %88 = arith.cmpi eq, %arg1, %c0_i32_40 : i32
    %89 = arith.extui %88 : i1 to i32
    %c0_i32_41 = arith.constant 0 : i32
    %90 = arith.cmpi ne, %89, %c0_i32_41 : i32
    scf.if %90 {
      %cst_42 = arith.constant 0.000000e+00 : f32
      %91 = vector.broadcast %cst_42 : f32 to vector<1x8x128xf32>
      %c0_43 = arith.constant 0 : index
      %c0_44 = arith.constant 0 : index
      %92 = vector.load %arg6[%c0_43, %c0_44] : memref<64x1xf32, #tpu.memory_space<vmem>>, vector<64x1xf32>
      %93 = vector.shape_cast %92 : vector<64x1xf32> to vector<1x64x1xf32>
      %cst_45 = arith.constant dense<0.000000e+00> : vector<1xf32>
      %94 = vector.multi_reduction <add>, %93, %cst_45 [1, 2] : vector<1x64x1xf32> to vector<1xf32>
      %95 = vector.shape_cast %94 : vector<1xf32> to vector<1x1x1xf32>
      %96 = vector.extract %95[0, 0, 0] : f32 from vector<1x1x1xf32>
      %97 = vector.broadcast %96 : f32 to vector<1x8x128xf32>
      %98 = arith.addf %91, %97 : vector<1x8x128xf32>
      %c0_46 = arith.constant 0 : index
      %c0_47 = arith.constant 0 : index
      %c0_48 = arith.constant 0 : index
      %99 = vector.load %arg4[%c0_46, %c0_47, %c0_48] : memref<1x8x128xf32, #tpu.memory_space<vmem>>, vector<1x8x128xf32>
      tpu.vector_store %arg4[%c0_46, %c0_47, %c0_48], %98 {strides = array<i32>} : memref<1x8x128xf32, #tpu.memory_space<vmem>>, vector<1x8x128xf32>,
      %cst_49 = arith.constant 0.000000e+00 : f32
      %100 = vector.broadcast %cst_49 : f32 to vector<1x8x128xf32>
      %c0_50 = arith.constant 0 : index
      %c0_51 = arith.constant 0 : index
      %101 = vector.load %arg7[%c0_50, %c0_51] : memref<64x1xf32, #tpu.memory_space<vmem>>, vector<64x1xf32>
      %102 = vector.shape_cast %101 : vector<64x1xf32> to vector<1x64x1xf32>
      %cst_52 = arith.constant dense<0.000000e+00> : vector<1xf32>
      %103 = vector.multi_reduction <add>, %102, %cst_52 [1, 2] : vector<1x64x1xf32> to vector<1xf32>
      %104 = vector.shape_cast %103 : vector<1xf32> to vector<1x1x1xf32>
      %105 = vector.extract %104[0, 0, 0] : f32 from vector<1x1x1xf32>
      %106 = vector.broadcast %105 : f32 to vector<1x8x128xf32>
      %107 = arith.addf %100, %106 : vector<1x8x128xf32>
      %c0_53 = arith.constant 0 : index
      %c0_54 = arith.constant 0 : index
      %c0_55 = arith.constant 0 : index
      %108 = vector.load %arg5[%c0_53, %c0_54, %c0_55] : memref<1x8x128xf32, #tpu.memory_space<vmem>>, vector<1x8x128xf32>
      tpu.vector_store %arg5[%c0_53, %c0_54, %c0_55], %107 {strides = array<i32>} : memref<1x8x128xf32, #tpu.memory_space<vmem>>, vector<1x8x128xf32>,
    } else {
    }
    return
  }
  func.func @transform_0(%arg0: i32, %arg1: i32) -> (i32, i32) {
    %c0_i32 = arith.constant 0 : i32
    %c0_i32_0 = arith.constant 0 : i32
    %c0_i32_1 = arith.constant 0 : i32
    return %c0_i32, %c0_i32_0 : i32, i32
  }
  func.func @transform_1(%arg0: i32, %arg1: i32) -> (i32, i32) {
    %c1_i32 = arith.constant 1 : i32
    %0 = arith.muli %arg0, %c1_i32 : i32
    %1 = arith.addi %0, %arg1 : i32
    %c0_i32 = arith.constant 0 : i32
    %c0_i32_0 = arith.constant 0 : i32
    return %1, %c0_i32 : i32, i32
  }
  func.func @transform_2(%arg0: i32, %arg1: i32) -> (i32, i32, i32) {
    %c0_i32 = arith.constant 0 : i32
    %c0_i32_0 = arith.constant 0 : i32
    %c0_i32_1 = arith.constant 0 : i32
    return %arg0, %c0_i32, %c0_i32_0 : i32, i32, i32
  }
  func.func @transform_3(%arg0: i32, %arg1: i32) -> (i32, i32, i32) {
    %c0_i32 = arith.constant 0 : i32
    %c0_i32_0 = arith.constant 0 : i32
    %c0_i32_1 = arith.constant 0 : i32
    return %arg0, %c0_i32, %c0_i32_0 : i32, i32, i32
  }
}

</mosaic_0001>

<bundles_post_ra>
// kernel: tpu_custom_call.1
= control target key start
LH: loop header
LB: loop body
LE: loop exit
PB: predicated region body
PF: predicated region fallthrough
CT: control target
= control target key end

     0   :  { %9 = vsyncpa [#allocation5], 0  ;;  %s990_s0 = inlined_call_operand.vmem [shape: s32[64,1], index: 0, kind: input, shape index: {}]   ;;  %s991_s1 = inlined_call_operand.hbm [shape: f32[64,256], index: 1, kind: input, shape index: {}]   ;;  %s992_s2 = inlined_call_operand.hbm [shape: f32[1,8,128], index: 2, kind: output, shape index: {0}]   ;;  %s993_s3 = inlined_call_operand.hbm [shape: f32[1,8,128], index: 3, kind: output, shape index: {1}]  }
   0x1   :  { %10 = vsyncpa [#allocation6], 0 }
   0x2   :  { %11 = vsyncpa [#allocation9], 0  ;;  %s649_s12 = smov [#allocation4]  }
   0x3   :  { %s24_s13 = sshll.u32 %s649_s12, 4  ;;  %s25_s13 = int_to_ptr.vmem [resolvable:$true] %s24_s13 }
   0x4   :  { %s591_s14 = scalar_lea.vmem %s25_s13, 2048  ;;  %p596_p1 = scmp.lt.s32.totalorder %s25_s13, %s25_s13 }
   0x5   :  { %p592_p0 = scmp.ne.s32.totalorder %s25_s13, %s591_s14  ;;  %p597_p2 = scmp.lt.s32.totalorder %s591_s14, %s591_s14 }
   0x7   :  { %p598_p3 = por %p597_p2, %p596_p1 }
   0x9   :  { %p599_p4 = pnand %p598_p3, %p592_p0 }
   0xb   :  { %602 = shalt.err (!%p599_p4)
}
   0xc   :  { %s650_s15 = smov 256   ;;  %s651_s16 = smov 16  }
   0xd   :  { %30 = dma.hbm_to_vmem [thread:$0]  %s991_s1, 2048, %s25_s13, [#allocation5], %s650_s15, %s650_s15, %s651_s16  }
   0xe   :  { %643 = dma.done.wait [#allocation5], 2048  }
   0xf   :  { %644 = vsyncadd [#allocation5], 4294965248  ;;  %vm40_vm0 = vcmask 7168   ;;  %v652_v0 = vmov 0   ;;  %v653_v1 = vmov 0.0   ;;  %v711_v2 = vld [vmem:[#allocation4 + $0x20] sm:$0xff] }
  0x10   :  { %534 = vset.pattern.permute.xlu1 %v652_v0  ;;  %50 = vst.msk [vmem:[#allocation3 + $0x8] sm:$0xff] %vm40_vm0, %v653_v1  ;;  %41 = vst.msk [vmem:[#allocation2] sm:$0xff] %vm40_vm0, %v653_v1  ;;  %533 = vset.pattern.permute.xlu0 %v652_v0  ;;  %v713_v3 = vld [vmem:[#allocation4 + $0x28] sm:$0xff]  ;;  %v715_v4 = vld [vmem:[#allocation4] sm:$0xff]  ;;  %s655_s8 = smov [#allocation8]  }
  0x11   :  { %42 = vst.msk [vmem:[#allocation2 + $0x8] sm:$0xff] %vm40_vm0, %v653_v1  ;;  %43 = vst.msk [vmem:[#allocation2 + $0x10] sm:$0xff] %vm40_vm0, %v653_v1  ;;  %v87_v5 = vmax.f32 %v711_v2, %v713_v3  ;;  %v719_v6 = vld [vmem:[#allocation4 + $0x8] sm:$0xff]  ;;  %v721_v7 = vld [vmem:[#allocation4 + $0x30] sm:$0xff]  ;;  %s501_s9 = sshll.u32 %s655_s8, 4  ;;  %s502_s9 = int_to_ptr.vmem [resolvable:$true] %s501_s9 }
  0x12   :  { %44 = vst.msk [vmem:[#allocation2 + $0x18] sm:$0xff] %vm40_vm0, %v653_v1  ;;  %45 = vst.msk [vmem:[#allocation2 + $0x20] sm:$0xff] %vm40_vm0, %v653_v1  ;;  %v723_v8 = vld [vmem:[#allocation4 + $0x38] sm:$0xff]  ;;  %v85_v9 = vmax.f32 %v715_v4, %v719_v6  ;;  %v727_v10 = vld [vmem:[#allocation4 + $0x10] sm:$0xff] }
  0x13   :  { %46 = vst.msk [vmem:[#allocation2 + $0x28] sm:$0xff] %vm40_vm0, %v653_v1  ;;  %47 = vst.msk [vmem:[#allocation2 + $0x30] sm:$0xff] %vm40_vm0, %v653_v1  ;;  %v729_v11 = vld [vmem:[#allocation4 + $0x18] sm:$0xff]  ;;  %v731_v12 = vld [vmem:[#allocation4 + $0x50] sm:$0xff]  ;;  %97 = vmax.xlane.f32.xlu1 %v87_v5  ;;  %v88_v13 = vmax.f32 %v721_v7, %v723_v8 }
  0x14   :  { %48 = vst.msk [vmem:[#allocation2 + $0x38] sm:$0xff] %vm40_vm0, %v653_v1  ;;  %49 = vst.msk [vmem:[#allocation3] sm:$0xff] %vm40_vm0, %v653_v1  ;;  %v735_v14 = vld [vmem:[#allocation4 + $0x58] sm:$0xff]  ;;  %v737_v15 = vld [vmem:[#allocation4 + $0x70] sm:$0xff]  ;;  %93 = vmax.xlane.f32.xlu0 %v85_v9  ;;  %v86_v17 = vmax.f32 %v727_v10, %v729_v11 }
  0x15   :  { %51 = vst.msk [vmem:[#allocation3 + $0x10] sm:$0xff] %vm40_vm0, %v653_v1  ;;  %52 = vst.msk [vmem:[#allocation3 + $0x18] sm:$0xff] %vm40_vm0, %v653_v1  ;;  %v739_v16 = vld [vmem:[#allocation4 + $0x78] sm:$0xff]  ;;  %v743_v18 = vld [vmem:[#allocation4 + $0x40] sm:$0xff]  ;;  %v90_v22 = vmax.f32 %v731_v12, %v735_v14 }
  0x16   :  { %53 = vst.msk [vmem:[#allocation3 + $0x20] sm:$0xff] %vm40_vm0, %v653_v1  ;;  %54 = vst.msk [vmem:[#allocation3 + $0x28] sm:$0xff] %vm40_vm0, %v653_v1  ;;  %v745_v19 = vld [vmem:[#allocation4 + $0x48] sm:$0xff]  ;;  %v92_v23 = vmax.f32 %v737_v15, %v739_v16  ;;  %v760_v24 = vld [vmem:[%s990_s0 + $0x10] sm:$0xff] }
  0x17   :  { %55 = vst.msk [vmem:[#allocation3 + $0x30] sm:$0xff] %vm40_vm0, %v653_v1  ;;  %56 = vst.msk [vmem:[#allocation3 + $0x38] sm:$0xff] %vm40_vm0, %v653_v1  ;;  %v750_v20 = vld [vmem:[%s990_s0 + $0x8] sm:$0xff]  ;;  %v765_v26 = vld [vmem:[%s990_s0 + $0x18] sm:$0xff]  ;;  %99 = vmax.xlane.f32.xlu1 %v88_v13  ;;  %v89_v27 = vmax.f32 %v743_v18, %v745_v19  ;;  %vm333_vm2 = vcmp.ne.s32.totalorder %v760_v24, 0 }
  0x18   :  { %v373_v21 = vld [vmem:[#allocation3 + $0x8] sm:$0xff]  ;;  %vm332_vm1 = vcmp.ne.s32.totalorder %v750_v20, 0  ;;  %v769_v28 = vld [vmem:[#allocation4 + $0x60] sm:$0xff]  ;;  %vm334_vm3 = vcmp.ne.s32.totalorder %v765_v26, 0  ;;  %95 = vmax.xlane.f32.xlu0 %v86_v17  ;;  %v516_v35 = vsel %vm333_vm2, 1.0, %v653_v1  ;;  %v798_v39 = vld [vmem:[%s990_s0 + $0x30] sm:$0xff] }
  0x19   :  { %v771_v29 = vld [vmem:[#allocation4 + $0x68] sm:$0xff]  ;;  %v515_v30 = vsel %vm332_vm1, 1.0, %v653_v1  ;;  %v781_v32 = vld [vmem:[%s990_s0 + $0x20] sm:$0xff]  ;;  %v517_v36 = vsel %vm334_vm3, 1.0, %v653_v1  ;;  %vm994_vm6 = vcmp.ne.s32.totalorder %v798_v39, 0  ;;  %v818_v48 = vld [vmem:[%s990_s0 + $0x38] sm:$0xff] }
  0x1a   :  { %v397_v34 = vadd.f32 %v515_v30, %v373_v21  ;;  %vm335_vm4 = vcmp.ne.s32.totalorder %v781_v32, 0  ;;  %v793_v37 = vld [vmem:[%s990_s0 + $0x28] sm:$0xff]  ;;  %v807_v44 = vld [vmem:[%s990_s0] sm:$0xff]  ;;  %v520_v51 = vsel %vm994_vm6, 1.0, %v653_v1  ;;  %vm338_vm8 = vcmp.ne.s32.totalorder %v818_v48, 0  ;;  %s654_s0 = smov [#allocation7]  }
  0x1b   :  { %v518_v42 = vsel %vm335_vm4, 1.0, %v653_v1  ;;  %vm336_vm5 = vcmp.ne.s32.totalorder %v793_v37, 0  ;;  %v372_v45 = vld [vmem:[#allocation3] sm:$0xff]  ;;  %vm331_vm7 = vcmp.ne.s32.totalorder %v807_v44, 0  ;;  %103 = vmax.xlane.f32.xlu1 %v90_v22  ;;  %v91_v53 = vmax.f32 %v769_v28, %v771_v29  ;;  %s491_s7 = sshll.u32 %s654_s0, 4  ;;  %s492_s7 = int_to_ptr.vmem [resolvable:$true] %s491_s7 }
  0x1c   :  { %v374_v25 = vld [vmem:[#allocation3 + $0x10] sm:$0xff]  ;;  %v375_v31 = vld [vmem:[#allocation3 + $0x18] sm:$0xff]  ;;  %405 = vst.msk [vmem:[#allocation3 + $0x8] sm:$0xff] %vm40_vm0, %v397_v34  ;;  %v519_v47 = vsel %vm336_vm5, 1.0, %v653_v1  ;;  %v514_v52 = vsel %vm331_vm7, 1.0, %v653_v1  ;;  %101 = vmax.xlane.f32.xlu0 %v89_v27  ;;  %v521_v56 = vsel %vm338_vm8, 1.0, %v653_v1  ;;  %p608_p6 = scmp.lt.s32.totalorder %s492_s7, %s492_s7 }
  0x1d   :  { %v376_v33 = vld [vmem:[#allocation3 + $0x20] sm:$0xff]  ;;  %v377_v38 = vld [vmem:[#allocation3 + $0x28] sm:$0xff]  ;;  %v398_v40 = vadd.f32 %v516_v35, %v374_v25  ;;  %v399_v41 = vadd.f32 %v517_v36, %v375_v31  ;;  %v396_v55 = vadd.f32 %v514_v52, %v372_v45  ;;  %s603_s12 = scalar_lea.vmem %s492_s7, 128 }
  0x1e   :  { %v378_v43 = vld [vmem:[#allocation3 + $0x30] sm:$0xff]  ;;  %v400_v46 = vadd.f32 %v518_v42, %v376_v33  ;;  %v379_v49 = vld [vmem:[#allocation3 + $0x38] sm:$0xff]  ;;  %v401_v50 = vadd.f32 %v519_v47, %v377_v38  ;;  %p604_p5 = scmp.ne.s32.totalorder %s492_s7, %s603_s12  ;;  %p609_p7 = scmp.lt.s32.totalorder %s603_s12, %s603_s12 }
  0x1f   :  { %406 = vst.msk [vmem:[#allocation3 + $0x10] sm:$0xff] %vm40_vm0, %v398_v40  ;;  %407 = vst.msk [vmem:[#allocation3 + $0x18] sm:$0xff] %vm40_vm0, %v399_v41  ;;  %v402_v54 = vadd.f32 %v520_v51, %v378_v43  ;;  %v403_v57 = vadd.f32 %v521_v56, %v379_v49  ;;  %107 = vmax.xlane.f32.xlu1 %v92_v23 }
  0x20   :  { %408 = vst.msk [vmem:[#allocation3 + $0x20] sm:$0xff] %vm40_vm0, %v400_v46  ;;  %409 = vst.msk [vmem:[#allocation3 + $0x28] sm:$0xff] %vm40_vm0, %v401_v50  ;;  %105 = vmax.xlane.f32.xlu0 %v91_v53  ;;  %p610_p8 = por %p609_p7, %p608_p6 }
  0x21   :  { %410 = vst.msk [vmem:[#allocation3 + $0x30] sm:$0xff] %vm40_vm0, %v402_v54  ;;  %404 = vst.msk [vmem:[#allocation3] sm:$0xff] %vm40_vm0, %v396_v55 }
  0x22   :  { %411 = vst.msk [vmem:[#allocation3 + $0x38] sm:$0xff] %vm40_vm0, %v403_v57  ;;  %p611_p9 = pnand %p610_p8, %p604_p5 }
  0x30   :  { %205 = vperm.xlu1 %534, %v750_v20  }
  0x34   :  { %208 = vperm.xlu1 %534, %v760_v24  }
  0x36   :  { %202 = vperm.xlu0 %533, %v807_v44  }
  0x38   :  { %211 = vperm.xlu1 %534, %v765_v26  }
  0x3c   :  { %214 = vperm.xlu1 %534, %v781_v32  }
  0x40   :  { %217 = vperm.xlu1 %534, %v793_v37  }
  0x44   :  { %220 = vperm.xlu1 %534, %v798_v39  }
  0x48   :  { %223 = vperm.xlu1 %534, %v818_v48  }
  0x9c   :  { %v847_v58 = vpop.xlane.xlu1 %97 }
  0x9d   :  { %v111_v59 = vsub.f32 %v711_v2, %v847_v58  ;;  %v143_v60 = vsub.f32 %v713_v3, %v847_v58  ;;  %v853_v61 = vpop.xlane.xlu0 %93 }
  0x9e   :  { %v109_v62 = vsub.f32 %v715_v4, %v853_v61  ;;  %v141_v63 = vsub.f32 %v719_v6, %v853_v61 }
  0x9f   :  { %v121_v0 = vmul.f32 1.442695, %v111_v59  ;;  %v153_v1 = vmul.f32 1.442695, %v143_v60 }
  0xa0   :  { %v117_v5 = vmul.f32 1.442695, %v109_v62  ;;  %v149_v9 = vmul.f32 1.442695, %v141_v63  ;;  %v859_v13 = vpop.xlane.xlu1 %99 }
  0xa1   :  { %535 = vpow2.f32 %v121_v0  ;;  %v112_v17 = vsub.f32 %v721_v7, %v859_v13  ;;  %v144_v21 = vsub.f32 %v723_v8, %v859_v13  ;;  %v865_v22 = vpop.xlane.xlu0 %95  ;;  %v197_v0 = vlaneseq }
  0xa2   :  { %537 = vpow2.f32 %v153_v1  ;;  %v110_v23 = vsub.f32 %v727_v10, %v865_v22  ;;  %v142_v25 = vsub.f32 %v729_v11, %v865_v22 }
  0xa3   :  { %539 = vpow2.f32 %v117_v5  ;;  %v123_v27 = vmul.f32 1.442695, %v112_v17  ;;  %v155_v30 = vmul.f32 1.442695, %v144_v21 }
  0xa4   :  { %541 = vpow2.f32 %v149_v9  ;;  %v119_v31 = vmul.f32 1.442695, %v110_v23  ;;  %v151_v33 = vmul.f32 1.442695, %v142_v25  ;;  %v871_v34 = vpop.xlane.xlu1 %103  ;;  %v897_v25 = vand.u32 127, %v197_v0 }
  0xa5   :  { %543 = vpow2.f32 %v123_v27  ;;  %v114_v35 = vsub.f32 %v731_v12, %v871_v34  ;;  %v146_v36 = vsub.f32 %v735_v14, %v871_v34  ;;  %v877_v38 = vpop.xlane.xlu0 %101 }
  0xa6   :  { %545 = vpow2.f32 %v155_v30  ;;  %v113_v40 = vsub.f32 %v743_v18, %v877_v38  ;;  %v145_v41 = vsub.f32 %v745_v19, %v877_v38 }
  0xa7   :  { %547 = vpow2.f32 %v119_v31  ;;  %v127_v42 = vmul.f32 1.442695, %v114_v35  ;;  %v159_v43 = vmul.f32 1.442695, %v146_v36 }
  0xa8   :  { %549 = vpow2.f32 %v151_v33  ;;  %v883_v45 = vpop.xlane.xlu1 %107  ;;  %v125_v46 = vmul.f32 1.442695, %v113_v40  ;;  %v157_v47 = vmul.f32 1.442695, %v145_v41  ;;  %v900_v41 = vadd.s32 128, %v897_v25 }
  0xa9   :  { %551 = vpow2.f32 %v127_v42  ;;  %v116_v49 = vsub.f32 %v737_v15, %v883_v45  ;;  %v148_v50 = vsub.f32 %v739_v16, %v883_v45  ;;  %v889_v51 = vpop.xlane.xlu0 %105 }
  0xaa   :  { %553 = vpow2.f32 %v159_v43  ;;  %v115_v52 = vsub.f32 %v769_v28, %v889_v51  ;;  %v147_v53 = vsub.f32 %v771_v29, %v889_v51 }
  0xab   :  { %v131_v54 = vmul.f32 1.442695, %v116_v49  ;;  %v163_v55 = vmul.f32 1.442695, %v148_v50  ;;  %555 = vpow2.f32 %v125_v46 }
  0xac   :  { %557 = vpow2.f32 %v157_v47  ;;  %v129_v56 = vmul.f32 1.442695, %v115_v52  ;;  %v161_v57 = vmul.f32 1.442695, %v147_v53  ;;  %v206_v59 = vpop.permute.xlu1 %205 }
  0xad   :  { %559 = vpow2.f32 %v131_v54  ;;  %vm226_vm9 = vcmp.eq.s32.totalorder %v897_v25, %v206_v59  ;;  %vm252_vm10 = vcmp.eq.s32.totalorder %v900_v41, %v206_v59 }
  0xae   :  { %v536_v60 = vpop.eup %535  ;;  %561 = vpow2.f32 %v163_v55 }
  0xaf   :  { %v538_v62 = vpop.eup %537  ;;  %563 = vpow2.f32 %v129_v56 }
  0xb0   :  { %v540_v63 = vpop.eup %539  ;;  %565 = vpow2.f32 %v161_v57  ;;  %v895_v1 = vpop.permute.xlu1 %208  ;;  %v167_v49 = vadd.f32 %v538_v62, %v536_v60  ;;  %v260_v60 = vsel %vm252_vm10, %v729_v11, 0.0 }
  0xb1   :  { %v542_v5 = vpop.eup %541  ;;  %v203_v52 = vpop.permute.xlu0 %202  ;;  %vm227_vm15 = vcmp.eq.s32.totalorder %v897_v25, %v895_v1 }
  0xb2   :  { %v544_v9 = vpop.eup %543  ;;  %v165_v17 = vadd.f32 %v542_v5, %v540_v63  ;;  %vm225_vm11 = vcmp.eq.s32.totalorder %v897_v25, %v203_v52  ;;  %vm251_vm12 = vcmp.eq.s32.totalorder %v900_v41, %v203_v52  ;;  %v234_v63 = vsel %vm226_vm9, %v727_v10, 0.0  ;;  %v457_v52 = vld [vmem:[#allocation3 + $0x38] sm:$0xff] }
  0xb3   :  { %v546_v21 = vpop.eup %545  ;;  %v233_v0 = vsel %vm225_vm11, %v715_v4, 0.0  ;;  %v259_v5 = vsel %vm251_vm12, %v719_v6, 0.0  ;;  %vm253_vm9 = vcmp.eq.s32.totalorder %v900_v41, %v895_v1 }
  0xb4   :  { %v548_v23 = vpop.eup %547  ;;  %173 = vadd.xlane.f32.xlu1 %v165_v17  ;;  %v212_v27 = vpop.permute.xlu1 %211  ;;  %v168_v30 = vadd.f32 %v546_v21, %v544_v9  ;;  %v268_v9 = vadd.f32 %v260_v60, %v234_v63  ;;  %v267_v4 = vadd.f32 %v259_v5, %v233_v0  ;;  %v235_v21 = vsel %vm227_vm15, %v711_v2, 0.0 }
  0xb5   :  { %v550_v31 = vpop.eup %549  ;;  %vm228_vm13 = vcmp.eq.s32.totalorder %v897_v25, %v212_v27  ;;  %vm254_vm14 = vcmp.eq.s32.totalorder %v900_v41, %v212_v27 }
  0xb6   :  { %v552_v33 = vpop.eup %551  ;;  %v166_v35 = vadd.f32 %v550_v31, %v548_v23  ;;  %v236_v10 = vsel %vm228_vm13, %v721_v7, 0.0  ;;  %v262_v11 = vsel %vm254_vm14, %v723_v8, 0.0  ;;  %v261_v7 = vsel %vm253_vm9, %v713_v3, 0.0 }
  0xb7   :  { %v554_v36 = vpop.eup %553  ;;  %v270_v6 = vadd.f32 %v262_v11, %v236_v10  ;;  %v269_v27 = vadd.f32 %v261_v7, %v235_v21 }
  0xb8   :  { %v556_v40 = vpop.eup %555  ;;  %179 = vadd.xlane.f32.xlu1 %v168_v30  ;;  %175 = vadd.xlane.f32.xlu0 %v166_v35  ;;  %v215_v42 = vpop.permute.xlu1 %214  ;;  %v170_v43 = vadd.f32 %v554_v36, %v552_v33  ;;  %v452_v36 = vld [vmem:[#allocation3 + $0x10] sm:$0xff] }
  0xb9   :  { %v558_v46 = vpop.eup %557  ;;  %vm229_vm11 = vcmp.eq.s32.totalorder %v897_v25, %v215_v42  ;;  %vm255_vm12 = vcmp.eq.s32.totalorder %v900_v41, %v215_v42  ;;  %v453_v42 = vld [vmem:[#allocation3 + $0x18] sm:$0xff] }
  0xba   :  { %v560_v47 = vpop.eup %559  ;;  %v169_v56 = vadd.f32 %v558_v46, %v556_v40  ;;  %v454_v46 = vld [vmem:[#allocation3 + $0x20] sm:$0xff] }
  0xbb   :  { %v562_v50 = vpop.eup %561 }
  0xbc   :  { %v564_v53 = vpop.eup %563  ;;  %183 = vadd.xlane.f32.xlu1 %v170_v43  ;;  %177 = vadd.xlane.f32.xlu0 %v167_v49  ;;  %v218_v54 = vpop.permute.xlu1 %217  ;;  %v172_v55 = vadd.f32 %v562_v50, %v560_v47  ;;  %v465_v47 = vsel %vm40_vm0, %v454_v46, 0.0  ;;  %v455_v49 = vld [vmem:[#allocation3 + $0x28] sm:$0xff]  ;;  %v456_v50 = vld [vmem:[#allocation3 + $0x30] sm:$0xff] }
  0xbd   :  { %v566_v57 = vpop.eup %565  ;;  %vm230_vm10 = vcmp.eq.s32.totalorder %v897_v25, %v218_v54  ;;  %vm256_vm6 = vcmp.eq.s32.totalorder %v900_v41, %v218_v54  ;;  %v467_v54 = vsel %vm40_vm0, %v455_v49, 0.0 }
  0xbe   :  { %v171_v62 = vadd.f32 %v566_v57, %v564_v53  ;;  %v238_v23 = vsel %vm230_vm10, %v731_v12, 0.0  ;;  %v264_v1 = vsel %vm256_vm6, %v735_v14, 0.0  ;;  %v237_v12 = vsel %vm229_vm11, %v743_v18, 0.0  ;;  %v451_v18 = vld [vmem:[#allocation3 + $0x8] sm:$0xff] }
  0xbf   :  { %v272_v8 = vadd.f32 %v264_v1, %v238_v23  ;;  %v263_v14 = vsel %vm255_vm12, %v745_v19, 0.0  ;;  %v471_v57 = vsel %vm40_vm0, %v457_v52, 0.0  ;;  %v344_v52 = vld [vmem:[#allocation2 + $0x28] sm:$0xff] }
  0xc0   :  { %187 = vadd.xlane.f32.xlu1 %v172_v55  ;;  %181 = vadd.xlane.f32.xlu0 %v169_v56  ;;  %v221_v59 = vpop.permute.xlu1 %220  ;;  %v271_v31 = vadd.f32 %v263_v14, %v237_v12  ;;  %v469_v55 = vsel %vm40_vm0, %v456_v50, 0.0 }
  0xc1   :  { %vm231_vm6 = vcmp.eq.s32.totalorder %v897_v25, %v221_v59  ;;  %vm257_vm15 = vcmp.eq.s32.totalorder %v900_v41, %v221_v59 }
  0xc2   :  { %v239_v33 = vsel %vm231_vm6, %v769_v28, 0.0  ;;  %v265_v35 = vsel %vm257_vm15, %v771_v29, 0.0  ;;  %v463_v28 = vsel %vm40_vm0, %v453_v42, 0.0 }
  0xc4   :  { %277 = vadd.xlane.f32.xlu1 %v268_v9  ;;  %185 = vadd.xlane.f32.xlu0 %v171_v62  ;;  %v224_v17 = vpop.permute.xlu1 %223 }
  0xc5   :  { %vm232_vm13 = vcmp.eq.s32.totalorder %v897_v25, %v224_v17  ;;  %vm258_vm14 = vcmp.eq.s32.totalorder %v900_v41, %v224_v17  ;;  %v459_v25 = vsel %vm40_vm0, %v451_v18, 0.0  ;;  %v461_v41 = vsel %vm40_vm0, %v452_v36, 0.0  ;;  %v342_v18 = vld [vmem:[#allocation2 + $0x18] sm:$0xff] }
  0xc6   :  { %v240_v2 = vsel %vm232_vm13, %v737_v15, 0.0  ;;  %v266_v30 = vsel %vm258_vm14, %v739_v16, 0.0  ;;  %v273_v15 = vadd.f32 %v265_v35, %v239_v33  ;;  %v450_v16 = vld [vmem:[#allocation3] sm:$0xff] }
  0xc7   :  { %v274_v3 = vadd.f32 %v266_v30, %v240_v2  ;;  %v458_v19 = vsel %vm40_vm0, %v450_v16, 0.0 }
  0xc8   :  { %281 = vadd.xlane.f32.xlu1 %v270_v6  ;;  %275 = vadd.xlane.f32.xlu0 %v267_v4  ;;  %v460_v40 = vadd.f32 %v459_v25, %v458_v19 }
  0xca   :  { %v462_v43 = vadd.f32 %v461_v41, %v460_v40 }
  0xcc   :  { %285 = vadd.xlane.f32.xlu1 %v272_v8  ;;  %279 = vadd.xlane.f32.xlu0 %v269_v27  ;;  %v464_v29 = vadd.f32 %v463_v28, %v462_v43 }
  0xce   :  { %v466_v53 = vadd.f32 %v465_v47, %v464_v29 }
  0xd0   :  { %289 = vadd.xlane.f32.xlu1 %v274_v3  ;;  %283 = vadd.xlane.f32.xlu0 %v271_v31  ;;  %v468_v56 = vadd.f32 %v467_v54, %v466_v53  ;;  %v339_v3 = vld [vmem:[#allocation2] sm:$0xff]  ;;  %v341_v54 = vld [vmem:[#allocation2 + $0x10] sm:$0xff] }
  0xd2   :  { %v470_v63 = vadd.f32 %v469_v55, %v468_v56 }
  0xd4   :  { %287 = vadd.xlane.f32.xlu0 %v273_v15  ;;  %v472_v60 = vadd.f32 %v471_v57, %v470_v63 }
  0xd6   :  { %473 = vadd.xlane.f32.xlu1 %v472_v60 }
 0x13d   :  { %v174_v59 = vpop.xlane.xlu1 %173 }
 0x13e   :  { %567 = vlog2.f32 %v174_v59 }
 0x141   :  { %v180_v62 = vpop.xlane.xlu1 %179  ;;  %v176_v0 = vpop.xlane.xlu0 %175 }
 0x142   :  { %569 = vlog2.f32 %v180_v62 }
 0x143   :  { %571 = vlog2.f32 %v176_v0 }
 0x145   :  { %v184_v5 = vpop.xlane.xlu1 %183  ;;  %v178_v9 = vpop.xlane.xlu0 %177 }
 0x146   :  { %573 = vlog2.f32 %v184_v5  ;;  %v346_v5 = vld [vmem:[#allocation2 + $0x38] sm:$0xff] }
 0x147   :  { %575 = vlog2.f32 %v178_v9 }
 0x149   :  { %v188_v10 = vpop.xlane.xlu1 %187  ;;  %v182_v11 = vpop.xlane.xlu0 %181 }
 0x14a   :  { %577 = vlog2.f32 %v188_v10  ;;  %v343_v10 = vld [vmem:[#allocation2 + $0x20] sm:$0xff] }
 0x14b   :  { %v568_v4 = vpop.eup %567  ;;  %579 = vlog2.f32 %v182_v11 }
 0x14c   :  { %v300_v17 = vmul.f32 0.6931472, %v568_v4 }
 0x14d   :  { %v278_v6 = vpop.xlane.xlu1 %277  ;;  %v186_v21 = vpop.xlane.xlu0 %185 }
 0x14e   :  { %581 = vlog2.f32 %v186_v21  ;;  %v315_v8 = vadd.f32 %v300_v17, %v853_v61  ;;  %v340_v61 = vld [vmem:[#allocation2 + $0x8] sm:$0xff] }
 0x14f   :  { %v570_v23 = vpop.eup %569 }
 0x150   :  { %v572_v1 = vpop.eup %571  ;;  %v306_v7 = vmul.f32 0.6931472, %v570_v23 }
 0x151   :  { %v302_v27 = vmul.f32 0.6931472, %v572_v1  ;;  %v282_v2 = vpop.xlane.xlu1 %281  ;;  %v276_v30 = vpop.xlane.xlu0 %275 }
 0x152   :  { %v318_v12 = vadd.f32 %v306_v7, %v859_v13  ;;  %v323_v14 = vsub.f32 %v315_v8, %v276_v30 }
 0x153   :  { %v574_v31 = vpop.eup %573  ;;  %v316_v33 = vadd.f32 %v302_v27, %v865_v22 }
 0x154   :  { %v576_v35 = vpop.eup %575  ;;  %v310_v15 = vmul.f32 0.6931472, %v574_v31  ;;  %v326_v16 = vsub.f32 %v318_v12, %v282_v2  ;;  %v347_v19 = vsel %vm331_vm7, %v323_v14, 0.0 }
 0x155   :  { %v304_v25 = vmul.f32 0.6931472, %v576_v35  ;;  %v324_v36 = vsub.f32 %v316_v33, %v278_v6  ;;  %v355_v40 = vadd.f32 %v347_v19, %v339_v3  ;;  %v286_v41 = vpop.xlane.xlu1 %285  ;;  %v280_v42 = vpop.xlane.xlu0 %279  ;;  %v345_v6 = vld [vmem:[#allocation2 + $0x30] sm:$0xff] }
 0x156   :  { %v350_v13 = vsel %vm334_vm3, %v326_v16, 0.0  ;;  %v320_v43 = vadd.f32 %v310_v15, %v871_v34 }
 0x157   :  { %v578_v28 = vpop.eup %577  ;;  %v348_v22 = vsel %vm332_vm1, %v324_v36, 0.0  ;;  %v358_v46 = vadd.f32 %v350_v13, %v342_v18  ;;  %364 = vst.msk [vmem:[#allocation2] sm:$0xff] %vm40_vm0, %v355_v40  ;;  %v317_v44 = vadd.f32 %v304_v25, %v847_v58  ;;  %vm995_vm1 = vcmp.ne.s32.totalorder %v798_v39, 0 }
 0x158   :  { %v580_v29 = vpop.eup %579  ;;  %v314_v47 = vmul.f32 0.6931472, %v578_v28  ;;  %v356_v49 = vadd.f32 %v348_v22, %v340_v61  ;;  %v328_v50 = vsub.f32 %v320_v43, %v286_v41 }
 0x159   :  { %v308_v53 = vmul.f32 0.6931472, %v580_v29  ;;  %367 = vst.msk [vmem:[#allocation2 + $0x18] sm:$0xff] %vm40_vm0, %v358_v46  ;;  %v325_v26 = vsub.f32 %v317_v44, %v280_v42  ;;  %v284_v34 = vpop.xlane.xlu0 %283  ;;  %v290_v63 = vpop.xlane.xlu1 %289 }
 0x15a   :  { %365 = vst.msk [vmem:[#allocation2 + $0x8] sm:$0xff] %vm40_vm0, %v356_v49  ;;  %v352_v20 = vsel %vm336_vm5, %v328_v50, 0.0  ;;  %v322_v55 = vadd.f32 %v314_v47, %v883_v45 }
 0x15b   :  { %v582_v56 = vpop.eup %581  ;;  %v360_v58 = vadd.f32 %v352_v20, %v344_v52  ;;  %v349_v57 = vsel %vm333_vm2, %v325_v26, 0.0  ;;  %v319_v60 = vadd.f32 %v308_v53, %v877_v38 }
 0x15c   :  { %v312_v59 = vmul.f32 0.6931472, %v582_v56  ;;  %v357_v62 = vadd.f32 %v349_v57, %v341_v54  ;;  %v330_v0 = vsub.f32 %v322_v55, %v290_v63 }
 0x15d   :  { %369 = vst.msk [vmem:[#allocation2 + $0x28] sm:$0xff] %vm40_vm0, %v360_v58  ;;  %v327_v9 = vsub.f32 %v319_v60, %v284_v34  ;;  %v288_v38 = vpop.xlane.xlu0 %287 }
 0x15e   :  { %366 = vst.msk [vmem:[#allocation2 + $0x10] sm:$0xff] %vm40_vm0, %v357_v62  ;;  %v354_v37 = vsel %vm338_vm8, %v330_v0, 0.0  ;;  %v321_v45 = vadd.f32 %v312_v59, %v889_v51  ;;  %v415_v21 = vld [vmem:[#allocation2] sm:$0xff] }
 0x15f   :  { %v362_v24 = vadd.f32 %v354_v37, %v346_v5  ;;  %v351_v11 = vsel %vm335_vm4, %v327_v9, 0.0  ;;  %v423_v7 = vsel %vm40_vm0, %v415_v21, 0.0  ;;  %v474_v40 = vpop.xlane.xlu1 %473 }
 0x160   :  { %v359_v4 = vadd.f32 %v351_v11, %v343_v10  ;;  %v329_v17 = vsub.f32 %v321_v45, %v288_v38  ;;  %v418_v8 = vld [vmem:[#allocation2 + $0x18] sm:$0xff]  ;;  %v475_v41 = vrot.slane %v474_v40, 4 }
 0x161   :  { %371 = vst.msk [vmem:[#allocation2 + $0x38] sm:$0xff] %vm40_vm0, %v362_v24  ;;  %v416_v23 = vld [vmem:[#allocation2 + $0x8] sm:$0xff]  ;;  %v428_v12 = vsel %vm40_vm0, %v418_v8, 0.0 }
 0x162   :  { %368 = vst.msk [vmem:[#allocation2 + $0x20] sm:$0xff] %vm40_vm0, %v359_v4  ;;  %v353_v48 = vsel %vm995_vm1, %v329_v17, 0.0  ;;  %v424_v1 = vsel %vm40_vm0, %v416_v23, 0.0  ;;  %v476_v42 = vadd.f32 %v475_v41, %v474_v40 }
 0x163   :  { %v361_v51 = vadd.f32 %v353_v48, %v345_v6  ;;  %v425_v27 = vadd.f32 %v424_v1, %v423_v7 }
 0x164   :  { %v420_v3 = vld [vmem:[#allocation2 + $0x28] sm:$0xff]  ;;  %v477_v13 = vrot.slane %v476_v42, 2 }
 0x165   :  { %370 = vst.msk [vmem:[#allocation2 + $0x30] sm:$0xff] %vm40_vm0, %v361_v51  ;;  %v417_v32 = vld [vmem:[#allocation2 + $0x10] sm:$0xff]  ;;  %v432_v15 = vsel %vm40_vm0, %v420_v3, 0.0 }
 0x166   :  { %v426_v2 = vsel %vm40_vm0, %v417_v32, 0.0  ;;  %v478_v46 = vadd.f32 %v477_v13, %v476_v42 }
 0x167   :  { %v427_v30 = vadd.f32 %v426_v2, %v425_v27 }
 0x168   :  { %v422_v16 = vld [vmem:[#allocation2 + $0x38] sm:$0xff]  ;;  %v479_v47 = vrot.slane %v478_v46, 1 }
 0x169   :  { %v419_v14 = vld [vmem:[#allocation2 + $0x20] sm:$0xff]  ;;  %v429_v31 = vadd.f32 %v428_v12, %v427_v30  ;;  %v436_v36 = vsel %vm40_vm0, %v422_v16, 0.0 }
 0x16a   :  { %v430_v39 = vsel %vm40_vm0, %v419_v14, 0.0  ;;  %v480_v52 = vadd.f32 %v479_v47, %v478_v46 }
 0x16b   :  { %v431_v33 = vadd.f32 %v430_v39, %v429_v31 }
 0x16c   :  { %v421_v35 = vld [vmem:[#allocation2 + $0x30] sm:$0xff] }
 0x16d   :  { %v433_v18 = vadd.f32 %v432_v15, %v431_v33  ;;  %v434_v19 = vsel %vm40_vm0, %v421_v35, 0.0 }
 0x16f   :  { %v435_v25 = vadd.f32 %v434_v19, %v433_v18 }
 0x171   :  { %v437_v61 = vadd.f32 %v436_v36, %v435_v25 }
 0x173   :  { %438 = vadd.xlane.f32.xlu0 %v437_v61 }
 0x1fc   :  { %v439_v43 = vpop.xlane.xlu0 %438 }
 0x1fd   :  { %v440_v28 = vrot.slane %v439_v43, 4 }
 0x1ff   :  { %v441_v22 = vadd.f32 %v440_v28, %v439_v43 }
 0x201   :  { %v442_v44 = vrot.slane %v441_v22, 2 }
 0x203   :  { %v443_v29 = vadd.f32 %v442_v44, %v441_v22 }
 0x205   :  { %v444_v49 = vrot.slane %v443_v29, 1 }
 0x207   :  { %v445_v50 = vadd.f32 %v444_v49, %v443_v29 }
 0x209   :  { %522 = vpush %v445_v50 }
 0x20a   :  { %524 = vpush %v480_v52 }
 0x23a   :  { %s523_s10 = spop %522 }
 0x23b   :  { %v447_v53 = vstv %s523_s10  ;;  %s525_s11 = spop %524 }
 0x23c   :  { %449 = vst [vmem:[#allocation7] sm:$0xff] %v447_v53  ;;  %v482_v26 = vstv %s525_s11 }
 0x23d   :  { %484 = vst [vmem:[#allocation8] sm:$0xff] %v482_v26 }
 0x23e   :  { %614 = shalt.err (!%p611_p9)
}
 0x23f   :  { %494 = dma.vmem_to_hbm [thread:$0]  %s492_s7, 128, %s992_s2, [#allocation6]  }
 0x240   :  { %s623_s15 = scalar_lea.vmem %s502_s9, 128  ;;  %p628_p11 = scmp.lt.s32.totalorder %s502_s9, %s502_s9 }
 0x241   :  { %p624_p10 = scmp.ne.s32.totalorder %s502_s9, %s623_s15  ;;  %p629_p12 = scmp.lt.s32.totalorder %s623_s15, %s623_s15 }
 0x243   :  { %p630_p13 = por %p629_p12, %p628_p11 }
 0x245   :  { %p631_p0 = pnand %p630_p13, %p624_p10 }
 0x247   :  { %634 = shalt.err (!%p631_p0)
}
 0x248   :  { %504 = dma.vmem_to_hbm [thread:$0]  %s502_s9, 128, %s993_s3, [#allocation9]  }
 0x249   :  { %645 = dma.done.wait [#allocation6], 128  }
 0x24a   :  { %646 = vsyncadd [#allocation6], 4294967168 }
 0x24b   :  { %647 = dma.done.wait [#allocation9], 128  }
 0x24c   :  { %648 = vsyncadd [#allocation9], 4294967168 }
 0x24d   :  { %511 = vsyncpa [#allocation5], 1 }
 0x24e   :  { %512 = vsyncpa [#allocation6], 1 }
 0x24f   :  { %513 = vsyncpa [#allocation9], 1 }

</bundles_post_ra>
